<compile_context>
chip_gen: v5e
topology: v5e:2x2
jax: 0.10.0
libtpu: 0.0.40
codegen_flags: <defaults>
</compile_context>

<pallas_src>
import jax
import jax.numpy as jnp
from jax.experimental import pallas as pl
from jax.experimental.pallas import tpu as pltpu

# ----------------------------- problem sizes -------------------------------
B = 2          # batch (cell-line / drug pairs)
N_GENES = 16   # gene nodes per cell graph
E_TYPES = 3    # multi-edge types (cell_edges_attr has 3 weight vectors)
N_EDGES = 24   # edges per cell graph (per edge type)
F_GENE = 8     # gene node feature dim
H_GENE = 32    # genes-encoder hidden dim
F_DRUG = 16    # drug fingerprint dim
H_DRUG = 32    # drug-encoder hidden dim
H_HEAD = 32    # prediction-head hidden dim

BN = B * N_GENES               # 32 : global node count (block-diag batch graph)
EH = E_TYPES * H_GENE          # 96 : packed gene-weight output width
K_AGG = E_TYPES * BN           # 96 : folded contraction dim of the aggregation

# --------------------- packed-slab layouts (host <-> kernel) ----------------
# weight slab: (128, 128) f32, one DMA
WG_R0 = 0                      # rows 0:8    cols 0:EH     Wg_packed (F_GENE, E*H)
WD1_R0 = 8                     # rows 8:24   cols 0:H_DRUG wd1
WD2_R0 = 24                    # rows 24:56  cols 0:H_DRUG wd2
WH1G_R0 = 56                   # rows 56:88  cols 0:H_HEAD wh1 (genes half)
WH1D_R0 = 88                   # rows 88:120 cols 0:H_HEAD wh1 (drug half)
BIAS_R0 = 120                  # rows 120:128 bias/misc block (see kernel)
W_ROWS, W_COLS = 128, 128

# data slab: (40, 128) f32, one DMA
DATA_ROWS, DATA_COLS = BN + 8, 128
# rows 0:BN   cols 0:F_GENE            -> xg_flat (B*N, F_GENE)
# rows BN:BN+B cols 0:F_DRUG           -> x_drug  (B, F_DRUG)
# rows BN:BN+B cols F_DRUG:F_DRUG+1    -> labels  (B, 1)

# packed output: (8, 128) f32; rows 0:B col 0 = pred, row B col 0 = loss
OUT_ROWS, OUT_COLS = 8, 128


# ------------------------ Pallas kernel (hot path) --------------------------
def drp_forward_kernel(adj_ref, data_ref, w_ref, out_ref):
    """Full DRP forward + MSE loss; 3 coalesced VMEM inputs, 1 packed output."""
    # ---- unpack inputs (static ref slices; 8-aligned row offsets) ----
    xg = data_ref[0:BN, 0:F_GENE]                                 # (32, 8)
    xd = data_ref[BN:BN + B, 0:F_DRUG]                            # (B, 16)
    y = data_ref[BN:BN + B, F_DRUG:F_DRUG + 1]                    # (B, 1)

    wg = w_ref[WG_R0:WG_R0 + F_GENE, 0:EH]                        # (8, 96)
    wd1 = w_ref[WD1_R0:WD1_R0 + F_DRUG, 0:H_DRUG]                 # (16, 32)
    wd2 = w_ref[WD2_R0:WD2_R0 + H_DRUG, 0:H_DRUG]                 # (32, 32)
    wh1g = w_ref[WH1G_R0:WH1G_R0 + H_GENE, 0:H_HEAD]              # (32, 32)
    wh1d = w_ref[WH1D_R0:WH1D_R0 + H_DRUG, 0:H_HEAD]              # (32, 32)
    misc = w_ref[BIAS_R0:BIAS_R0 + 8, :]                          # (8, 128)
    bg = misc[0:1, 0:H_GENE]
    bd1 = misc[1:2, 0:H_DRUG]
    bd2 = misc[2:3, 0:H_DRUG]
    bh1 = misc[3:4, 0:H_HEAD]
    wh2 = misc[4:5, 0:H_HEAD]
    bh2 = misc[5:6, 0:1]
    pool = misc[6:8, 0:BN]                                        # (B, B*N) mean-pool matrix

    # ---- genes encoder: 2 fat contractions instead of 12 tiny ones ----
    # XW[s, e*H + h] = sum_f xg[s, f] * Wg[e, f, h]   (one 32x8x96 matmul)
    xw = jnp.dot(xg, wg, preferred_element_type=jnp.float32)      # (32, 96)
    # restack the E lane-blocks along sublanes: rows ordered [e][src_global]
    xw_stack = jnp.concatenate(
        [xw[:, e * H_GENE:(e + 1) * H_GENE] for e in range(E_TYPES)], axis=0)  # (96, 32)
    # single aggregation matmul, K = E_TYPES * B * N_GENES (block-diag batch)
    h = jnp.dot(adj_ref[...], xw_stack, preferred_element_type=jnp.float32)    # (32, 32)
    h = jnp.maximum(h + bg, 0.0)                                  # bias+ReLU once, batched
    g = jnp.dot(pool, h, preferred_element_type=jnp.float32)      # (B, H_GENE) mean pooling

    # ---- drug encoder: 2-layer MLP ----
    d = jnp.maximum(jnp.dot(xd, wd1, preferred_element_type=jnp.float32) + bd1, 0.0)
    d = jnp.maximum(jnp.dot(d, wd2, preferred_element_type=jnp.float32) + bd2, 0.0)

    # ---- prediction head: split wh1 -> no lane concat ----
    z = (jnp.dot(g, wh1g, preferred_element_type=jnp.float32)
         + jnp.dot(d, wh1d, preferred_element_type=jnp.float32) + bh1)
    z = jnp.maximum(z, 0.0)                                       # (B, H_HEAD)
    # final 1-out projection as a lane-reduce (XLU slot), not an N=1 matmul
    pred = jnp.sum(z * wh2, axis=-1, keepdims=True) + bh2         # (B, 1)

    # ---- MSE loss (mean over all elements, like nn.MSELoss) ----
    diff = pred - y
    loss = jnp.mean(diff * diff, axis=(0, 1), keepdims=True)      # (1, 1)

    # ---- packed output ----
    out_ref[...] = jnp.zeros((OUT_ROWS, OUT_COLS), jnp.float32)
    out_ref[0:B, 0:1] = pred
    out_ref[B:B + 1, 0:1] = loss


def drp_forward(adj_stack, data_slab, w_slab):
    """One pallas_call; 3 coalesced inputs, 1 packed output (all VMEM)."""
    vmem = pl.BlockSpec(memory_space=pltpu.MemorySpace.VMEM)
    out = pl.pallas_call(
        drp_forward_kernel,
        out_shape=jax.ShapeDtypeStruct((OUT_ROWS, OUT_COLS), jnp.float32),
        in_specs=[vmem, vmem, vmem],
        out_specs=vmem,
    )(adj_stack, data_slab, w_slab)
    pred = out[0:B, 0:1]        # (B, 1)
    loss = out[B, 0]            # scalar
    return pred, loss


# ------------------------- plain-JAX glue (wrapper) --------------------------
def scatter_edges_index(batch, cell_edges_index, num_genes_nodes):
    """Mirror of MultiEdgeDRPNet._scatter_edges_index (1-indexed -> 0-indexed)."""
    outs0 = [cell_edges_index[0, :]]
    outs1 = [cell_edges_index[1, :]]
    for b in range(batch - 1):
        outs0.append(cell_edges_index[0, :] + (b + 1) * num_genes_nodes)
        outs1.append(cell_edges_index[1, :] + (b + 1) * num_genes_nodes)
    t0 = jnp.concatenate(outs0) - 1
    t1 = jnp.concatenate(outs1) - 1
    return jnp.stack([t0, t1], axis=0)                  # (2, N_EDGES * batch)


def scatter_edges_attr(batch, cell_edges_attr):
    """Mirror of MultiEdgeDRPNet._scatter_edges_attr."""
    rows = [jnp.concatenate([w] * batch) for w in cell_edges_attr]
    return jnp.stack(rows, axis=0)                      # (3, N_EDGES * batch)


def build_adjacency_stack(edge_index, edge_attr, batch, n_nodes):
    """Dense block-diagonal multi-edge adjacency, built with one-hot matmuls
    (no scatter-add).  Layout: A_stack[dst_g, e*(B*N) + src_g] to match the
    kernel's folded-K aggregation; duplicate edges accumulate (scatter-add
    semantics)."""
    bn = batch * n_nodes
    src = edge_index[0]
    dst = edge_index[1]
    oh_dst = jax.nn.one_hot(dst, bn, dtype=jnp.float32)           # (nE, BN)
    oh_src = jax.nn.one_hot(src, bn, dtype=jnp.float32)           # (nE, BN)
    a = jnp.einsum("jd,ej,js->eds", oh_dst, edge_attr, oh_src)    # (E, BN, BN)
    return jnp.transpose(a, (1, 0, 2)).reshape(bn, E_TYPES * bn)  # (BN, E*BN)


def init_params(key):
    ks = jax.random.split(key, 10)
    s = 0.1
    return {
        "wg":  s * jax.random.normal(ks[0], (E_TYPES, F_GENE, H_GENE), jnp.float32),
        "bg":  s * jax.random.normal(ks[1], (1, H_GENE), jnp.float32),
        "wd1": s * jax.random.normal(ks[2], (F_DRUG, H_DRUG), jnp.float32),
        "bd1": s * jax.random.normal(ks[3], (1, H_DRUG), jnp.float32),
        "wd2": s * jax.random.normal(ks[4], (H_DRUG, H_DRUG), jnp.float32),
        "bd2": s * jax.random.normal(ks[5], (1, H_DRUG), jnp.float32),
        "wh1": s * jax.random.normal(ks[6], (H_GENE + H_DRUG, H_HEAD), jnp.float32),
        "bh1": s * jax.random.normal(ks[7], (1, H_HEAD), jnp.float32),
        "wh2": s * jax.random.normal(ks[8], (1, H_HEAD), jnp.float32),
        "bh2": s * jax.random.normal(ks[9], (1, 1), jnp.float32),
    }


def pack_params(params):
    """Coalesce all weights/biases into one lane-dense (128,128) f32 slab."""
    w = jnp.zeros((W_ROWS, W_COLS), jnp.float32)
    # Wg_packed[f, e*H + h] = wg[e, f, h]
    wg_packed = jnp.transpose(params["wg"], (1, 0, 2)).reshape(F_GENE, EH)
    w = w.at[WG_R0:WG_R0 + F_GENE, 0:EH].set(wg_packed)
    w = w.at[WD1_R0:WD1_R0 + F_DRUG, 0:H_DRUG].set(params["wd1"])
    w = w.at[WD2_R0:WD2_R0 + H_DRUG, 0:H_DRUG].set(params["wd2"])
    # split wh1 so the kernel never concatenates [g, d]
    w = w.at[WH1G_R0:WH1G_R0 + H_GENE, 0:H_HEAD].set(params["wh1"][:H_GENE])
    w = w.at[WH1D_R0:WH1D_R0 + H_DRUG, 0:H_HEAD].set(params["wh1"][H_GENE:])
    # bias / misc block
    w = w.at[BIAS_R0 + 0, 0:H_GENE].set(params["bg"][0])
    w = w.at[BIAS_R0 + 1, 0:H_DRUG].set(params["bd1"][0])
    w = w.at[BIAS_R0 + 2, 0:H_DRUG].set(params["bd2"][0])
    w = w.at[BIAS_R0 + 3, 0:H_HEAD].set(params["bh1"][0])
    w = w.at[BIAS_R0 + 4, 0:H_HEAD].set(params["wh2"][0])
    w = w.at[BIAS_R0 + 5, 0:1].set(params["bh2"][0])
    # mean-pooling matrix P[b, s_g] = 1/N_GENES for s_g in batch b's block
    pool = jnp.kron(jnp.eye(B, dtype=jnp.float32),
                    jnp.ones((1, N_GENES), jnp.float32)) / N_GENES
    w = w.at[BIAS_R0 + 6:BIAS_R0 + 8, 0:BN].set(pool)
    return w


def pack_data(x_genes, x_drug, y):
    """Coalesce xg / xd / labels into one lane-dense (40,128) f32 slab."""
    d = jnp.zeros((DATA_ROWS, DATA_COLS), jnp.float32)
    d = d.at[0:BN, 0:F_GENE].set(x_genes.reshape(BN, F_GENE))
    d = d.at[BN:BN + B, 0:F_DRUG].set(x_drug)
    d = d.at[BN:BN + B, F_DRUG:F_DRUG + 1].set(y)
    return d


@jax.jit
def _forward_impl(adj_stack, x_genes, x_drug, y, w_slab):
    data_slab = pack_data(x_genes, x_drug, y)
    return drp_forward(adj_stack, data_slab, w_slab)


def forward_train(data, labels, w_slab):
    """Mirror of MultiEdgeDRPNet.forward_train (losses dict + results)."""
    y = labels.reshape(-1, 1).astype(jnp.float32)       # labels.view(-1, 1).float()
    pred, loss = _forward_impl(data["adj_stack"], data["x_genes"],
                               data["x_drug"], y, w_slab)
    losses = {"loss_drp": loss}
    return dict(
        losses=losses,
        num_samples=int(y.shape[0]),
        results=dict(labels=y, output=pred),
    )


# TODO(synk): train_step / optimizer, build_backbone/build_loss config plumbing,
#             evaluate() metrics and .cuda()/.cpu() transfers have no Pallas
#             equivalent and are omitted.

if __name__ == "__main__":
    key = jax.random.PRNGKey(0)
    k_x, k_d, k_y, k_ei, k_ea, k_p = jax.random.split(key, 6)

    # deterministic synthetic batch (a `data` graph batch + labels `y`)
    x_genes = jax.random.normal(k_x, (B, N_GENES, F_GENE), jnp.float32)
    x_drug = jax.random.normal(k_d, (B, F_DRUG), jnp.float32)
    labels = jax.random.normal(k_y, (B,), jnp.float32)

    # per-cell-line gene graph, 1-indexed as in the PyTorch helpers
    cell_edges_index = jax.random.randint(k_ei, (2, N_EDGES), 1, N_GENES + 1, jnp.int32)
    ka = jax.random.split(k_ea, E_TYPES)
    cell_edges_attr = [jax.random.uniform(ka[e], (N_EDGES,), jnp.float32)
                       for e in range(E_TYPES)]

    # update_encoder_buffer: scatter edges across the batch, build dense adjacency
    # (one-hot matmuls; no scatter-add), laid out for the folded-K aggregation.
    edge_index = scatter_edges_index(B, cell_edges_index, N_GENES)
    edge_attr = scatter_edges_attr(B, cell_edges_attr)
    adj_stack = build_adjacency_stack(edge_index, edge_attr, B, N_GENES)

    params = init_params(k_p)
    w_slab = pack_params(params)
    data = {"adj_stack": adj_stack, "x_genes": x_genes, "x_drug": x_drug}

    outputs = forward_train(data, labels, w_slab)
    jax.block_until_ready(outputs["results"]["output"])
    jax.block_until_ready(outputs["losses"]["loss_drp"])

    assert outputs["results"]["output"].shape == (B, 1)
    assert outputs["losses"]["loss_drp"].shape == ()
    print("KERNEL_OK")
</pallas_src>

<mosaic_0001>
module attributes {stable_mosaic.version = 11 : i64} {
  func.func @drp_forward_kernel(%arg0: memref<32x96xf32, #tpu.memory_space<vmem>>, %arg1: memref<40x128xf32, #tpu.memory_space<vmem>>, %arg2: memref<128x128xf32, #tpu.memory_space<vmem>>, %arg3: memref<8x128xf32, #tpu.memory_space<vmem>>) attributes {dimension_semantics = [], scalar_prefetch = 0 : i64, scratch_operands = 0 : i64, tpu.core_type = #tpu.core_type<tc>} {
    %c0 = arith.constant 0 : index
    %c0_0 = arith.constant 0 : index
    %0 = vector.load %arg1[%c0, %c0_0] : memref<40x128xf32, #tpu.memory_space<vmem>>, vector<32x8xf32>
    %c32 = arith.constant 32 : index
    %c0_1 = arith.constant 0 : index
    %1 = vector.load %arg1[%c32, %c0_1] : memref<40x128xf32, #tpu.memory_space<vmem>>, vector<2x16xf32>
    %c32_2 = arith.constant 32 : index
    %c16 = arith.constant 16 : index
    %2 = vector.load %arg1[%c32_2, %c16] : memref<40x128xf32, #tpu.memory_space<vmem>>, vector<2x1xf32>
    %c0_3 = arith.constant 0 : index
    %c0_4 = arith.constant 0 : index
    %3 = vector.load %arg2[%c0_3, %c0_4] : memref<128x128xf32, #tpu.memory_space<vmem>>, vector<8x96xf32>
    %c8 = arith.constant 8 : index
    %c0_5 = arith.constant 0 : index
    %4 = vector.load %arg2[%c8, %c0_5] : memref<128x128xf32, #tpu.memory_space<vmem>>, vector<16x32xf32>
    %c24 = arith.constant 24 : index
    %c0_6 = arith.constant 0 : index
    %5 = vector.load %arg2[%c24, %c0_6] : memref<128x128xf32, #tpu.memory_space<vmem>>, vector<32x32xf32>
    %c56 = arith.constant 56 : index
    %c0_7 = arith.constant 0 : index
    %6 = vector.load %arg2[%c56, %c0_7] : memref<128x128xf32, #tpu.memory_space<vmem>>, vector<32x32xf32>
    %c88 = arith.constant 88 : index
    %c0_8 = arith.constant 0 : index
    %7 = vector.load %arg2[%c88, %c0_8] : memref<128x128xf32, #tpu.memory_space<vmem>>, vector<32x32xf32>
    %c120 = arith.constant 120 : index
    %c0_9 = arith.constant 0 : index
    %8 = vector.load %arg2[%c120, %c0_9] : memref<128x128xf32, #tpu.memory_space<vmem>>, vector<8x128xf32>
    %9 = vector.extract_strided_slice %8 {offsets = [0, 0], sizes = [1, 32], strides = [1, 1]} : vector<8x128xf32> to vector<1x32xf32>
    %10 = vector.extract_strided_slice %8 {offsets = [1, 0], sizes = [1, 32], strides = [1, 1]} : vector<8x128xf32> to vector<1x32xf32>
    %11 = vector.extract_strided_slice %8 {offsets = [2, 0], sizes = [1, 32], strides = [1, 1]} : vector<8x128xf32> to vector<1x32xf32>
    %12 = vector.extract_strided_slice %8 {offsets = [3, 0], sizes = [1, 32], strides = [1, 1]} : vector<8x128xf32> to vector<1x32xf32>
    %13 = vector.extract_strided_slice %8 {offsets = [4, 0], sizes = [1, 32], strides = [1, 1]} : vector<8x128xf32> to vector<1x32xf32>
    %14 = vector.extract_strided_slice %8 {offsets = [5, 0], sizes = [1, 1], strides = [1, 1]} : vector<8x128xf32> to vector<1x1xf32>
    %15 = vector.extract_strided_slice %8 {offsets = [6, 0], sizes = [2, 32], strides = [1, 1]} : vector<8x128xf32> to vector<2x32xf32>
    %cst = arith.constant dense<0.000000e+00> : vector<32x96xf32>
    %16 = tpu.matmul %0, %3, %cst {dimension_numbers = #tpu.dot_dimension_numbers<[1], [0], [0], [1], [0, 0, 1, 1], [], []>} : vector<32x8xf32>, vector<8x96xf32>, vector<32x96xf32> -> vector<32x96xf32>
    %17 = vector.extract_strided_slice %16 {offsets = [0, 0], sizes = [32, 32], strides = [1, 1]} : vector<32x96xf32> to vector<32x32xf32>
    %18 = vector.extract_strided_slice %16 {offsets = [0, 32], sizes = [32, 32], strides = [1, 1]} : vector<32x96xf32> to vector<32x32xf32>
    %19 = vector.extract_strided_slice %16 {offsets = [0, 64], sizes = [32, 32], strides = [1, 1]} : vector<32x96xf32> to vector<32x32xf32>
    %20 = tpu.concatenate %17, %18, %19 in 0 : vector<32x32xf32>, vector<32x32xf32>, vector<32x32xf32> -> vector<96x32xf32>
    %c0_10 = arith.constant 0 : index
    %c0_11 = arith.constant 0 : index
    %21 = vector.load %arg0[%c0_10, %c0_11] : memref<32x96xf32, #tpu.memory_space<vmem>>, vector<32x96xf32>
    %cst_12 = arith.constant dense<0.000000e+00> : vector<32x32xf32>
    %22 = tpu.matmul %21, %20, %cst_12 {dimension_numbers = #tpu.dot_dimension_numbers<[1], [0], [0], [1], [0, 0, 1, 1], [], []>} : vector<32x96xf32>, vector<96x32xf32>, vector<32x32xf32> -> vector<32x32xf32>
    %23 = vector.broadcast %9 : vector<1x32xf32> to vector<32x32xf32>
    %24 = arith.addf %22, %23 : vector<32x32xf32>
    %cst_13 = arith.constant 0.000000e+00 : f32
    %25 = vector.broadcast %cst_13 : f32 to vector<32x32xf32>
    %26 = arith.maximumf %24, %25 : vector<32x32xf32>
    %cst_14 = arith.constant dense<0.000000e+00> : vector<2x32xf32>
    %27 = tpu.matmul %15, %26, %cst_14 {dimension_numbers = #tpu.dot_dimension_numbers<[1], [0], [0], [1], [0, 0, 1, 1], [], []>} : vector<2x32xf32>, vector<32x32xf32>, vector<2x32xf32> -> vector<2x32xf32>
    %cst_15 = arith.constant dense<0.000000e+00> : vector<2x32xf32>
    %28 = tpu.matmul %1, %4, %cst_15 {dimension_numbers = #tpu.dot_dimension_numbers<[1], [0], [0], [1], [0, 0, 1, 1], [], []>} : vector<2x16xf32>, vector<16x32xf32>, vector<2x32xf32> -> vector<2x32xf32>
    %29 = vector.broadcast %10 : vector<1x32xf32> to vector<2x32xf32>
    %30 = arith.addf %28, %29 : vector<2x32xf32>
    %cst_16 = arith.constant 0.000000e+00 : f32
    %31 = vector.broadcast %cst_16 : f32 to vector<2x32xf32>
    %32 = arith.maximumf %30, %31 : vector<2x32xf32>
    %cst_17 = arith.constant dense<0.000000e+00> : vector<2x32xf32>
    %33 = tpu.matmul %32, %5, %cst_17 {dimension_numbers = #tpu.dot_dimension_numbers<[1], [0], [0], [1], [0, 0, 1, 1], [], []>} : vector<2x32xf32>, vector<32x32xf32>, vector<2x32xf32> -> vector<2x32xf32>
    %34 = vector.broadcast %11 : vector<1x32xf32> to vector<2x32xf32>
    %35 = arith.addf %33, %34 : vector<2x32xf32>
    %cst_18 = arith.constant 0.000000e+00 : f32
    %36 = vector.broadcast %cst_18 : f32 to vector<2x32xf32>
    %37 = arith.maximumf %35, %36 : vector<2x32xf32>
    %cst_19 = arith.constant dense<0.000000e+00> : vector<2x32xf32>
    %38 = tpu.matmul %27, %6, %cst_19 {dimension_numbers = #tpu.dot_dimension_numbers<[1], [0], [0], [1], [0, 0, 1, 1], [], []>} : vector<2x32xf32>, vector<32x32xf32>, vector<2x32xf32> -> vector<2x32xf32>
    %cst_20 = arith.constant dense<0.000000e+00> : vector<2x32xf32>
    %39 = tpu.matmul %37, %7, %cst_20 {dimension_numbers = #tpu.dot_dimension_numbers<[1], [0], [0], [1], [0, 0, 1, 1], [], []>} : vector<2x32xf32>, vector<32x32xf32>, vector<2x32xf32> -> vector<2x32xf32>
    %40 = arith.addf %38, %39 : vector<2x32xf32>
    %41 = vector.broadcast %12 : vector<1x32xf32> to vector<2x32xf32>
    %42 = arith.addf %40, %41 : vector<2x32xf32>
    %cst_21 = arith.constant 0.000000e+00 : f32
    %43 = vector.broadcast %cst_21 : f32 to vector<2x32xf32>
    %44 = arith.maximumf %42, %43 : vector<2x32xf32>
    %45 = vector.broadcast %13 : vector<1x32xf32> to vector<2x32xf32>
    %46 = arith.mulf %44, %45 : vector<2x32xf32>
    %cst_22 = arith.constant dense<0.000000e+00> : vector<2xf32>
    %47 = vector.multi_reduction <add>, %46, %cst_22 [1] : vector<2x32xf32> to vector<2xf32>
    %48 = vector.shape_cast %47 : vector<2xf32> to vector<2x1xf32>
    %49 = vector.broadcast %14 : vector<1x1xf32> to vector<2x1xf32>
    %50 = arith.addf %48, %49 : vector<2x1xf32>
    %51 = arith.subf %50, %2 : vector<2x1xf32>
    %52 = arith.mulf %51, %51 : vector<2x1xf32>
    %53 = vector.shape_cast %52 : vector<2x1xf32> to vector<1x2x1xf32>
    %cst_23 = arith.constant dense<0.000000e+00> : vector<1xf32>
    %54 = vector.multi_reduction <add>, %53, %cst_23 [1, 2] : vector<1x2x1xf32> to vector<1xf32>
    %55 = vector.shape_cast %54 : vector<1xf32> to vector<1x1x1xf32>
    %56 = vector.extract %55[0, 0, 0] : f32 from vector<1x1x1xf32>
    %57 = vector.broadcast %56 : f32 to vector<1x1xf32>
    %cst_24 = arith.constant 2.000000e+00 : f32
    %58 = vector.broadcast %cst_24 : f32 to vector<1x1xf32>
    %59 = arith.divf %57, %58 : vector<1x1xf32>
    %cst_25 = arith.constant 0.000000e+00 : f32
    %60 = vector.broadcast %cst_25 : f32 to vector<8x128xf32>
    %c0_26 = arith.constant 0 : index
    %c0_27 = arith.constant 0 : index
    %61 = vector.load %arg3[%c0_26, %c0_27] : memref<8x128xf32, #tpu.memory_space<vmem>>, vector<8x128xf32>
    tpu.vector_store %arg3[%c0_26, %c0_27], %60 {strides = array<i32>} : memref<8x128xf32, #tpu.memory_space<vmem>>, vector<8x128xf32>,
    %c0_28 = arith.constant 0 : index
    %c0_29 = arith.constant 0 : index
    %62 = vector.load %arg3[%c0_28, %c0_29] : memref<8x128xf32, #tpu.memory_space<vmem>>, vector<2x1xf32>
    tpu.vector_store %arg3[%c0_28, %c0_29], %50 {strides = array<i32>} : memref<8x128xf32, #tpu.memory_space<vmem>>, vector<2x1xf32>,
    %c2 = arith.constant 2 : index
    %c0_30 = arith.constant 0 : index
    %63 = vector.load %arg3[%c2, %c0_30] : memref<8x128xf32, #tpu.memory_space<vmem>>, vector<1x1xf32>
    tpu.vector_store %arg3[%c2, %c0_30], %59 {strides = array<i32>} : memref<8x128xf32, #tpu.memory_space<vmem>>, vector<1x1xf32>,
    return
  }
}

</mosaic_0001>

<bundles_post_ra>
// kernel: _forward_impl.1
= control target key start
LH: loop header
LB: loop body
LE: loop exit
PB: predicated region body
PF: predicated region fallthrough
CT: control target
= control target key end

     0   :  { %8 = vsyncpa [#allocation3], 0  ;;  %s410_s15 = smov [#allocation2]   ;;  %s411_s17 = smov 128   ;;  %s494_s0 = inlined_call_operand.vmem [shape: f32[32,96], index: 0, kind: input, shape index: {}]   ;;  %s495_s1 = inlined_call_operand.vmem [shape: f32[40,128], index: 1, kind: input, shape index: {}]   ;;  %s496_s2 = inlined_call_operand.hbm [shape: f32[128,128], index: 2, kind: input, shape index: {}]   ;;  %s497_s3 = inlined_call_operand.vmem [shape: f32[8,128], index: 3, kind: output, shape index: {}]  }
   0x1   :  { %s17_s14 = sshll.u32 %s496_s2, 4  ;;  %s19_s16 = sshll.u32 %s410_s15, 4  ;;  %s18_s14 = int_to_ptr.hbm [resolvable:$true] %s17_s14  ;;  %s20_s16 = int_to_ptr.vmem [resolvable:$true] %s19_s16 }
   0x2   :  { %s412_s18 = smov 8  }
   0x3   :  { %25 = dma.hbm_to_vmem [thread:$0]  %s18_s14, 2048, %s20_s16, [#allocation3], %s411_s17, %s411_s17, %s412_s18  }
   0x4   :  { %408 = dma.done.wait [#allocation3], 2048  }
   0x5   :  { %409 = vsyncadd [#allocation3], 4294965248  ;;  %vm51_vm0 = vcmask 64512   ;;  %v35_v0 = vld [vmem:[#allocation2] sm:$0xff]  ;;  %v31_v2 = vld [vmem:[%s495_s1 + $0x8] sm:$0xff]  ;;  %s413_s26 = smov 96  }
   0x6   :  { %v30_v1 = vld [vmem:[%s495_s1] sm:$0xff]  ;;  %79 = vmatpush.msra.mxu0 %v35_v0  ;;  %v32_v3 = vld [vmem:[%s495_s1 + $0x10] sm:$0xff]  ;;  %v33_v4 = vld [vmem:[%s495_s1 + $0x18] sm:$0xff]  ;;  %s414_s27 = smov 64   ;;  %vm198_vm1 = vcmask 130048   ;;  %vm126_vm2 = vcmask 785408  }
   0x7   :  { %339 = vmatmul.msk.f32.vlgmr.msra.gmra.mxu0 %vm51_vm0, %v30_v1  ;;  %v37_v20 = vld [vmem:[#allocation2 + $0x10] sm:$0xff]  ;;  %v36_v21 = vld [vmem:[#allocation2 + $0x8] sm:$0xff]  ;;  %v456_v23 = vld [vmem:[%s495_s1 + $0x20] sm:$0x3]  ;;  %vm174_vm3 = vcmask 261120   ;;  %vm299_vm4 = vcmask 254976  }
   0x8   :  { %216 = vmatpush.msra.mxu3 %v37_v20  ;;  %v121_v26 = vld [vmem:[%s494_s0] sm:$0xff]  ;;  %v122_v27 = vld [vmem:[%s494_s0 + $0x8] sm:$0xff]  ;;  %v123_v28 = vld [vmem:[%s494_s0 + $0x10] sm:$0xff]  ;;  %vm310_vm5 = vcmask 1024   ;;  %vm332_vm7 = vcmask 0  }
   0x9   :  { %v124_v29 = vld [vmem:[%s494_s0 + $0x18] sm:$0xff]  ;;  %v41_v31 = vld [vmem:[#allocation2 + $0x30] sm:$0xff]  ;;  %v40_v32 = vld [vmem:[#allocation2 + $0x28] sm:$0xff]  ;;  %s415_s0 = smov 112  }
   0xa   :  { %217 = vmatpush.msra.mxu3 %v36_v21  ;;  %v471_v30 = vld [vmem:[#allocation2 + $0x78] sm:$0xff]  ;;  %v39_v35 = vld [vmem:[#allocation2 + $0x20] sm:$0xff]  ;;  %v45_v40 = vld [vmem:[#allocation2 + $0x50] sm:$0xff] }
   0xb   :  { %348 = vmatmul.msk.f32.vlgmr.msra.gmra.mxu3 %vm198_vm1, %v456_v23  ;;  %v197_v33 = vperm.slane %v471_v30, 1  ;;  %v38_v38 = vld [vmem:[#allocation2 + $0x18] sm:$0xff]  ;;  %v44_v41 = vld [vmem:[#allocation2 + $0x48] sm:$0xff]  ;;  %v125_v44 = vperm.slane %v471_v30, 0  ;;  %v173_v53 = vrot.slane %v471_v30, 6  ;;  %v49_v55 = vld [vmem:[#allocation2 + $0x70] sm:$0xff] }
   0xc   :  { %239 = vmatpush.msrb.mxu3 %v41_v31  ;;  %v48_v56 = vld [vmem:[#allocation2 + $0x68] sm:$0xff]  ;;  %v47_v57 = vld [vmem:[#allocation2 + $0x60] sm:$0xff]  ;;  %v46_v59 = vld [vmem:[#allocation2 + $0x58] sm:$0xff]  ;;  %v223_v61 = vperm.slane %v471_v30, 2 }
   0xd   :  { %v43_v58 = vld [vmem:[#allocation2 + $0x40] sm:$0xff]  ;;  %v42_v60 = vld [vmem:[#allocation2 + $0x38] sm:$0xff] }
   0xe   :  { %240 = vmatpush.msrb.mxu3 %v40_v32 }
   0xf   :  { %340 = vmatmul.msk.f32.gmra.mxu0 %vm51_vm0, %v31_v2 }
  0x10   :  { %241 = vmatpush.msrb.mxu3 %v39_v35 }
  0x12   :  { %242 = vmatpush.msrb.mxu3 %v38_v38 }
  0x14   :  { %286 = vmatpush.msra.mxu3 %v45_v40 }
  0x16   :  { %287 = vmatpush.msra.mxu3 %v44_v41 }
  0x17   :  { %341 = vmatmul.msk.f32.gmra.mxu0 %vm51_vm0, %v32_v3  ;;  %v294_v3 = vperm.slane %v471_v30, 3 }
  0x18   :  { %288 = vmatpush.msra.mxu3 %v43_v58 }
  0x1a   :  { %289 = vmatpush.msra.mxu3 %v42_v60 }
  0x1f   :  { %342 = vmatmul.msk.f32.gmra.mxu0 %vm51_vm0, %v33_v4 }
  0x84   :  { %v81_v5 = vpop.f32.mrf.mxu0 }
  0x8c   :  { %v84_v6 = vpop.f32.mrf.mxu0 }
  0x8d   :  { %v377_v10 = vpack.i.bf16 %v81_v5, %v84_v6 }
  0x8e   :  { %v219_v34 = vpop.f32.mrf.mxu3 }
  0x8f   :  { %v220_v36 = vadd.f32 %v219_v34, %v197_v33 }
  0x91   :  { %v222_v37 = vmax.f32 %v220_v36, 0.0 }
  0x93   :  { %349 = vmatmul.msk.f32.vlgmr.msrb.gmra.mxu3 %vm174_vm3, %v222_v37 }
  0x94   :  { %v87_v7 = vpop.f32.mrf.mxu0 }
  0x9c   :  { %v90_v8 = vpop.f32.mrf.mxu0 }
  0x9d   :  { %v372_v9 = vpack.i.bf16 %v87_v7, %v90_v8 }
  0x9f   :  { %373 = vrot.lane.b32.xlu1 %v372_v9, %s413_s26  ;;  %363 = vrot.lane.b32.xlu0 %v372_v9, %s414_s27 }
  0xa7   :  { %378 = vrot.lane.b32.xlu1 %v377_v10, %s413_s26  ;;  %368 = vrot.lane.b32.xlu0 %v377_v10, %s414_s27 }
 0x111   :  { %v364_v11 = vpop.permute.xlu0 %363  ;;  %v374_v14 = vpop.permute.xlu1 %373 }
 0x112   :  { %v365_v12 = vunpack.i.l.bf16 %v364_v11  ;;  %v366_v13 = vunpack.i.h.bf16 %v364_v11  ;;  %v375_v18 = vunpack.i.l.bf16 %v374_v14  ;;  %v376_v22 = vunpack.i.h.bf16 %v374_v14 }
 0x113   :  { %v416_v11 = vmov 0.0  }
 0x114   :  { %143 = vmatpush.msra.mxu1 %v365_v12  ;;  %330 = vst [vmem:[%s497_s3] sm:$0xff] %v416_v11  ;;  %v303_v12 = vperm.slane %v471_v30, 5 }
 0x116   :  { %144 = vmatpush.msra.mxu1 %v366_v13  ;;  %v244_v62 = vpop.f32.mrf.mxu3 }
 0x117   :  { %v245_v63 = vadd.f32 %v244_v62, %v223_v61 }
 0x119   :  { %v369_v15 = vpop.permute.xlu0 %368  ;;  %v379_v19 = vpop.permute.xlu1 %378  ;;  %v247_v0 = vmax.f32 %v245_v63, 0.0 }
 0x11a   :  { %v370_v16 = vunpack.i.l.bf16 %v369_v15  ;;  %v371_v17 = vunpack.i.h.bf16 %v369_v15  ;;  %v380_v24 = vunpack.i.l.bf16 %v379_v19  ;;  %v381_v25 = vunpack.i.h.bf16 %v379_v19 }
 0x11c   :  { %145 = vmatpush.msra.mxu1 %v370_v16 }
 0x11e   :  { %146 = vmatpush.msra.mxu1 %v371_v17 }
 0x120   :  { %147 = vmatpush.msra.mxu1 %v375_v18 }
 0x122   :  { %148 = vmatpush.msra.mxu1 %v376_v22 }
 0x124   :  { %149 = vmatpush.msra.mxu1 %v380_v24 }
 0x126   :  { %150 = vmatpush.msra.mxu1 %v381_v25 }
 0x128   :  { %151 = vmatpush.msra.mxu1 %v90_v8 }
 0x12a   :  { %152 = vmatpush.msra.mxu1 %v87_v7  ;;  %v297_v7 = vperm.slane %v471_v30, 4 }
 0x12c   :  { %153 = vmatpush.msra.mxu1 %v84_v6 }
 0x12e   :  { %154 = vmatpush.msra.mxu1 %v81_v5 }
 0x12f   :  { %343 = vmatmul.msk.f32.vlgmr.msra.gmra.mxu1 %vm126_vm2, %v121_v26  ;;  %v417_v26 = vmov 2.0  }
 0x130   :  { %382 = vrcp.f32 %v417_v26 }
 0x137   :  { %344 = vmatmul.msk.f32.gmra.mxu1 %vm126_vm2, %v122_v27  ;;  %v383_v27 = vpop.eup %382 }
 0x138   :  { %vm327_vm6 = vweird.f32 %v383_v27 }
 0x13f   :  { %345 = vmatmul.msk.f32.gmra.mxu1 %vm126_vm2, %v123_v28  ;;  %v323_v28 = vmul.f32 2.0, %v383_v27 }
 0x147   :  { %346 = vmatmul.msk.f32.gmra.mxu1 %vm126_vm2, %v124_v29  ;;  %v324_v29 = vsub.f32 1.0, %v323_v28 }
 0x149   :  { %v325_v30 = vmul.f32 %v383_v27, %v324_v29 }
 0x14b   :  { %v326_v31 = vadd.f32 %v383_v27, %v325_v30 }
 0x14d   :  { %v328_v32 = vsel %vm327_vm6, %v383_v27, %v326_v31 }
 0x1ac   :  { %v156_v39 = vpop.f32.mrf.mxu1 }
 0x1ad   :  { %v157_v50 = vadd.f32 %v156_v39, %v125_v44 }
 0x1af   :  { %v168_v54 = vmax.f32 %v157_v50, 0.0 }
 0x1b4   :  { %v159_v42 = vpop.f32.mrf.mxu1 }
 0x1b5   :  { %v160_v48 = vadd.f32 %v159_v42, %v125_v44 }
 0x1b7   :  { %v169_v52 = vmax.f32 %v160_v48, 0.0 }
 0x1bc   :  { %v162_v43 = vpop.f32.mrf.mxu1 }
 0x1bd   :  { %v163_v46 = vadd.f32 %v162_v43, %v125_v44 }
 0x1bf   :  { %v170_v51 = vmax.f32 %v163_v46, 0.0 }
 0x1c4   :  { %v165_v45 = vpop.f32.mrf.mxu1 }
 0x1c5   :  { %v166_v47 = vadd.f32 %v165_v45, %v125_v44 }
 0x1c7   :  { %v171_v49 = vmax.f32 %v166_v47, 0.0 }
 0x1c9   :  { %189 = vmatpush.msra.mxu2 %v171_v49 }
 0x1cb   :  { %190 = vmatpush.msra.mxu2 %v170_v51 }
 0x1cd   :  { %191 = vmatpush.msra.mxu2 %v169_v52 }
 0x1cf   :  { %192 = vmatpush.msra.mxu2 %v168_v54 }
 0x1d0   :  { %347 = vmatmul.msk.f32.vlgmr.msra.gmra.mxu2 %vm174_vm3, %v173_v53 }
 0x1d1   :  { %263 = vmatpush.msrb.mxu2 %v49_v55 }
 0x1d3   :  { %264 = vmatpush.msrb.mxu2 %v48_v56 }
 0x1d5   :  { %265 = vmatpush.msrb.mxu2 %v47_v57 }
 0x1d7   :  { %266 = vmatpush.msrb.mxu2 %v46_v59 }
 0x1d8   :  { %350 = vmatmul.msk.f32.vlgmr.msrb.gmra.mxu2 %vm174_vm3, %v247_v0 }
 0x253   :  { %v194_v1 = vpop.f32.mrf.mxu2 }
 0x254   :  { %351 = vmatmul.msk.f32.vlgmr.msra.gmra.mxu3 %vm174_vm3, %v194_v1 }
 0x25b   :  { %v268_v2 = vpop.f32.mrf.mxu2 }
 0x2d7   :  { %v291_v4 = vpop.f32.mrf.mxu3 }
 0x2d8   :  { %v292_v5 = vadd.f32 %v291_v4, %v268_v2 }
 0x2da   :  { %v295_v6 = vadd.f32 %v294_v3, %v292_v5 }
 0x2dc   :  { %v296_v8 = vmax.f32 %v295_v6, 0.0 }
 0x2de   :  { %v298_v9 = vmul.f32 %v297_v7, %v296_v8 }
 0x2e0   :  { %v300_v10 = vsel %vm299_vm4, %v298_v9, 0.0 }
 0x2e1   :  { %301 = vadd.xlane.f32.xlu2 %v300_v10 }
 0x2f9   :  { %305 = vrot.lane.b32.xlu2 %v456_v23, %s415_s0 }
 0x354   :  { %v302_v13 = vpop.xlane.xlu2 %301 }
 0x355   :  { %v304_v14 = vadd.f32 %v303_v12, %v302_v13 }
 0x357   :  { %331 = vst.msk [vmem:[%s497_s3] sm:$0x3] %vm310_vm5, %v304_v14 }
 0x35c   :  { %v306_v15 = vpop.permute.xlu2 %305 }
 0x35d   :  { %v308_v16 = vsub.f32 %v304_v14, %v306_v15 }
 0x35f   :  { %v309_v17 = vmul.f32 %v308_v16, %v308_v16 }
 0x361   :  { %v311_v18 = vsel %vm310_vm5, %v309_v17, 0.0 }
 0x362   :  { %312 = vadd.xlane.f32.xlu0 %v311_v18 }
 0x3d5   :  { %v313_v19 = vpop.xlane.xlu0 %312 }
 0x3d6   :  { %v314_v20 = vrot.slane %v313_v19, 4 }
 0x3d8   :  { %v315_v21 = vadd.f32 %v314_v20, %v313_v19 }
 0x3da   :  { %v316_v22 = vrot.slane %v315_v21, 2 }
 0x3dc   :  { %v317_v23 = vadd.f32 %v316_v22, %v315_v21 }
 0x3de   :  { %v318_v24 = vrot.slane %v317_v23, 1 }
 0x3e0   :  { %v319_v25 = vadd.f32 %v318_v24, %v317_v23 }
 0x3e2   :  { %352 = vpush %v319_v25 }
 0x413   :  { %s353_s14 = spop %352 }
 0x414   :  { %v321_v33 = vstv %s353_s14 }
 0x415   :  { %v329_v34 = vmul.f32 %v328_v32, %v321_v33 }
 0x417   :  { %333 = vst.msk [vmem:[%s497_s3 + $0x2] sm:$0x1] %vm332_vm7, %v329_v34 }
 0x418   :  { %338 = vsyncpa [#allocation3], 1 }

</bundles_post_ra>
